<compile_context>
chip_gen: v6e
topology: v6e:2x2x1
jax: 0.10.0
libtpu: 0.0.40
codegen_flags: <defaults>
</compile_context>

<pallas_src>
import functools

import jax
import jax.numpy as jnp
from jax.experimental import pallas as pl
from jax.experimental.pallas import tpu as pltpu


def _round_up(x, m):
    return (x + m - 1) // m * m


def _vmem_capacity_bytes():
    try:
        return int(pltpu.get_tpu_info().vmem_capacity_bytes)
    except Exception:
        return 64 * 1024 * 1024        # conservative fallback (v7x-sized)


def _has_bf16_vpu():
    # v6e / v7x have a bf16 VPU+EUP; v5e and earlier do not.  Conservative:
    # only enable the bf16 post-matmul path on generations we can identify.
    try:
        kind = jax.devices()[0].device_kind.lower()
    except Exception:
        kind = ""
    return any(tag in kind for tag in ("v6", "v7", "7x"))


def _pick_row_tile(R, Cp, Hp, Cop, compute_itemsize, vmem_budget, row_tile=None):
    if row_tile is None:
        # 128-MiB parts (v5e/v6e) take big tiles; 64-MiB parts (v7x) smaller.
        row_tile = 1024 if vmem_budget >= (72 << 20) else 256
    # Keep >= 2 row tiles so both v7x TensorCores get work (no-op on 1-TC chips).
    row_tile = max(8, min(_round_up(row_tile, 8), _round_up(pl.cdiv(R, 2), 8)))
    # Resident constants (single-buffered weights + biases + gamma/beta).
    const_bytes = (Cp * Hp + Hp * Cop) * compute_itemsize + (2 * Cp + Hp + Cop) * 4
    while row_tile > 8:
        tile_bytes = row_tile * (
            2 * Cp * 4                  # input tile, double-buffered, f32
            + 2 * Cop * 4               # output tile, double-buffered, f32
            + Cp * 4                    # xhat
            + Hp * 4                    # fc1 accumulator / GELU intermediate
            + Hp * compute_itemsize     # bf16 copy fed to fc2
            + Cop * 4)                  # fc2 accumulator
        if const_bytes + tile_bytes <= vmem_budget:
            break
        row_tile = max(8, _round_up(row_tile // 2, 8))
    return row_tile


def mlp_kernel(x_ref, gamma_ref, beta_ref, w1_ref, b1_ref, w2_ref, b2_ref,
               o_ref, *, eps, inv_c, approximate_gelu, compute_dtype):
    # ---- LayerNorm, one-pass f32 stats (padded lanes are zero) ----
    x = x_ref[...].astype(jnp.float32)                        # (TM, Cp)
    s1 = jnp.sum(x, axis=-1, keepdims=True)
    s2 = jnp.sum(x * x, axis=-1, keepdims=True)
    mean = s1 * inv_c
    var = s2 * inv_c - mean * mean
    xhat = (x - mean) * jax.lax.rsqrt(var + eps)
    # gamma/beta are zero-padded -> padded lanes come out exactly 0 here.
    xhat = xhat * gamma_ref[...] + beta_ref[...]

    # ---- fc1 : bf16 MXU operands, f32 accumulation ----
    h = jnp.dot(xhat.astype(compute_dtype), w1_ref[...],
                preferred_element_type=jnp.float32)
    # b1's dtype selects the post-matmul precision: bf16 on v6e/v7x, f32 on v5e.
    h = h.astype(b1_ref.dtype) + b1_ref[...]
    h = jax.nn.gelu(h, approximate=approximate_gelu)

    # ---- fc2 ----
    y = jnp.dot(h.astype(compute_dtype), w2_ref[...],
                preferred_element_type=jnp.float32) + b2_ref[...]

    # dropout p=0.0 -> identity (both applications in the torch module)
    o_ref[...] = y.astype(o_ref.dtype)


def prepare_params(params, *, compute_dtype=jnp.bfloat16, eps=1e-5,
                   postmatmul_bf16=None):
    """One-time parameter prep: lane-pad features to multiples of 128 and
    pre-cast matmul operands to compute_dtype.  Weights are stored (in, out)."""
    C, H = params["w1"].shape
    Co = params["w2"].shape[1]
    Cp, Hp, Cop = (_round_up(d, 128) for d in (C, H, Co))
    if postmatmul_bf16 is None:
        postmatmul_bf16 = (compute_dtype == jnp.bfloat16) and _has_bf16_vpu()
    bias1_dtype = compute_dtype if postmatmul_bf16 else jnp.float32
    f32 = jnp.float32
    return {
        "gamma": jnp.pad(params["gamma"].astype(f32), (0, Cp - C)).reshape(1, Cp),
        "beta":  jnp.pad(params["beta"].astype(f32), (0, Cp - C)).reshape(1, Cp),
        "w1": jnp.pad(params["w1"].astype(compute_dtype),
                      ((0, Cp - C), (0, Hp - H))),
        "b1": jnp.pad(params["b1"].astype(bias1_dtype), (0, Hp - H)).reshape(1, Hp),
        "w2": jnp.pad(params["w2"].astype(compute_dtype),
                      ((0, Hp - H), (0, Cop - Co))),
        "b2": jnp.pad(params["b2"].astype(f32), (0, Cop - Co)).reshape(1, Cop),
        "dims": (C, H, Co),
        "padded": (Cp, Hp, Cop),
        "eps": eps,
        "compute_dtype": compute_dtype,
    }


def mlp_pallas(x, prepped, *, approximate_gelu=True, row_tile=None):
    """x: (B, N, C).  prepped: output of prepare_params()."""
    B, N, C = x.shape
    C0, H, Co = prepped["dims"]
    assert C == C0, "input channel dim does not match prepared params"
    Cp, Hp, Cop = prepped["padded"]
    compute_dtype = prepped["compute_dtype"]
    eps = prepped["eps"]
    R = B * N

    x2d = x.reshape(R, C)
    if Cp != C:                                   # lane-pad only when needed
        x2d = jnp.pad(x2d, ((0, 0), (0, Cp - C)))

    vmem_budget = int(_vmem_capacity_bytes() * 0.8)
    itemsize = jnp.dtype(compute_dtype).itemsize
    tm = _pick_row_tile(R, Cp, Hp, Cop, itemsize, vmem_budget, row_tile)
    grid = (pl.cdiv(R, tm),)                      # no row padding; last block partial

    cost = pl.CostEstimate(
        flops=2 * R * (Cp * Hp + Hp * Cop),
        transcendentals=R * Hp,                   # tanh / erf in GELU
        bytes_accessed=(x2d.size * x2d.dtype.itemsize
                        + prepped["w1"].size * itemsize
                        + prepped["w2"].size * itemsize
                        + R * Cop * x.dtype.itemsize),
    )

    kernel = functools.partial(
        mlp_kernel, eps=eps, inv_c=1.0 / C,
        approximate_gelu=approximate_gelu, compute_dtype=compute_dtype)

    def call(single_buffer_consts):
        def const_spec(shape):
            if single_buffer_consts:
                # Constant across the grid -> single buffer, halves its VMEM.
                return pl.BlockSpec(shape, lambda i: (0, 0),
                                    pipeline_mode=pl.Buffered(1))
            return pl.BlockSpec(shape, lambda i: (0, 0))

        return pl.pallas_call(
            kernel,
            out_shape=jax.ShapeDtypeStruct((R, Cop), x.dtype),
            grid_spec=pltpu.PrefetchScalarGridSpec(
                num_scalar_prefetch=0,
                grid=grid,
                in_specs=[
                    pl.BlockSpec((tm, Cp), lambda i: (i, 0)),   # x rows
                    const_spec((1, Cp)),                        # LN gamma (f32)
                    const_spec((1, Cp)),                        # LN beta  (f32)
                    const_spec((Cp, Hp)),                       # fc1 weight (bf16)
                    const_spec((1, Hp)),                        # fc1 bias
                    const_spec((Hp, Cop)),                      # fc2 weight (bf16)
                    const_spec((1, Cop)),                       # fc2 bias (f32)
                ],
                out_specs=pl.BlockSpec((tm, Cop), lambda i: (i, 0)),
            ),
            compiler_params=pltpu.CompilerParams(
                dimension_semantics=("parallel",),
                vmem_limit_bytes=vmem_budget),
            cost_estimate=cost,
        )(x2d, prepped["gamma"], prepped["beta"], prepped["w1"],
          prepped["b1"], prepped["w2"], prepped["b2"])

    try:
        out = call(True)
    except Exception:
        # Fallback for JAX versions without pipeline_mode / Buffered(1) support.
        out = call(False)

    if Cop != Co:
        out = out[:, :Co]                         # strip lane padding
    return out.reshape(B, N, Co)


def init_params(key, in_features, hidden_features, out_features, dtype=jnp.float32):
    k1, k2, k3, k4 = jax.random.split(key, 4)
    w1 = (jax.random.normal(k1, (in_features, hidden_features), dtype)
          * (1.0 / jnp.sqrt(in_features)))
    b1 = jax.random.normal(k2, (hidden_features,), dtype) * 0.01
    w2 = (jax.random.normal(k3, (hidden_features, out_features), dtype)
          * (1.0 / jnp.sqrt(hidden_features)))
    b2 = jax.random.normal(k4, (out_features,), dtype) * 0.01
    gamma = jnp.ones((in_features,), dtype)
    beta = jnp.zeros((in_features,), dtype)
    return dict(gamma=gamma, beta=beta, w1=w1, b1=b1, w2=w2, b2=b2)


def mlp_reference(x, p, eps=1e-5):
    # Full-f32 reference matching the PyTorch module (exact-erf GELU).
    mean = jnp.mean(x, axis=-1, keepdims=True)
    var = jnp.mean((x - mean) ** 2, axis=-1, keepdims=True)
    xn = (x - mean) / jnp.sqrt(var + eps) * p["gamma"] + p["beta"]
    h = jax.nn.gelu(xn @ p["w1"] + p["b1"], approximate=False)
    return h @ p["w2"] + p["b2"]


if __name__ == "__main__":
    key = jax.random.PRNGKey(0)

    def run_case(case_key, B, N, C, Hdim, Co):
        kx, kp = jax.random.split(case_key)
        x = jax.random.normal(kx, (B, N, C), jnp.float32)
        params = init_params(kp, C, Hdim, Co)
        prepped = prepare_params(params)           # one-time weight prep
        y = jax.block_until_ready(mlp_pallas(x, prepped))
        y_ref = mlp_reference(x, params)
        assert y.shape == (B, N, Co)
        # bf16 matmul operands (f32 accumulation) + tanh-GELU vs. the exact-erf
        # f32 reference -> tolerance is deliberately loose.
        assert jnp.allclose(y, y_ref, atol=5e-2, rtol=5e-2), (
            f"mismatch vs reference, max abs err={float(jnp.max(jnp.abs(y - y_ref)))}")

    k1, k2 = jax.random.split(key)
    # Small lane-padded case (C, H not multiples of 128).
    run_case(k1, 2, 8, 32, 64, 32)
    # Lane-aligned case with a partial last row block (exercises masked stores).
    run_case(k2, 2, 100, 128, 256, 128)

    print("KERNEL_OK")
</pallas_src>

<mosaic_0001>
module attributes {stable_mosaic.version = 11 : i64} {
  func.func @mlp_kernel(%arg0: i32, %arg1: memref<8x128xf32, #tpu.memory_space<vmem>>, %arg2: memref<1x128xf32, #tpu.memory_space<vmem>>, %arg3: memref<1x128xf32, #tpu.memory_space<vmem>>, %arg4: memref<128x128xbf16, #tpu.memory_space<vmem>>, %arg5: memref<1x128xf32, #tpu.memory_space<vmem>>, %arg6: memref<128x128xbf16, #tpu.memory_space<vmem>>, %arg7: memref<1x128xf32, #tpu.memory_space<vmem>>, %arg8: memref<8x128xf32, #tpu.memory_space<vmem>>) attributes {dimension_semantics = [#tpu.dimension_semantics<parallel>], iteration_bounds = array<i64: 2>, scalar_prefetch = 0 : i64, scratch_operands = 0 : i64, tpu.core_type = #tpu.core_type<tc>, window_params = [{transform_indices = @transform_0, window_bounds = array<i64: 8, 128>}, {pipeline_mode = #tpu.pipeline_mode<synchronous>, transform_indices = @transform_1, window_bounds = array<i64: 1, 128>}, {pipeline_mode = #tpu.pipeline_mode<synchronous>, transform_indices = @transform_2, window_bounds = array<i64: 1, 128>}, {pipeline_mode = #tpu.pipeline_mode<synchronous>, transform_indices = @transform_3, window_bounds = array<i64: 128, 128>}, {pipeline_mode = #tpu.pipeline_mode<synchronous>, transform_indices = @transform_4, window_bounds = array<i64: 1, 128>}, {pipeline_mode = #tpu.pipeline_mode<synchronous>, transform_indices = @transform_5, window_bounds = array<i64: 128, 128>}, {pipeline_mode = #tpu.pipeline_mode<synchronous>, transform_indices = @transform_6, window_bounds = array<i64: 1, 128>}, {transform_indices = @transform_7, window_bounds = array<i64: 8, 128>}]} {
    %c0 = arith.constant 0 : index
    %c0_0 = arith.constant 0 : index
    %0 = vector.load %arg1[%c0, %c0_0] : memref<8x128xf32, #tpu.memory_space<vmem>>, vector<8x128xf32>
    %cst = arith.constant dense<0.000000e+00> : vector<8xf32>
    %1 = vector.multi_reduction <add>, %0, %cst [1] : vector<8x128xf32> to vector<8xf32>
    %2 = vector.shape_cast %1 : vector<8xf32> to vector<8x1xf32>
    %3 = arith.mulf %0, %0 : vector<8x128xf32>
    %cst_1 = arith.constant dense<0.000000e+00> : vector<8xf32>
    %4 = vector.multi_reduction <add>, %3, %cst_1 [1] : vector<8x128xf32> to vector<8xf32>
    %5 = vector.shape_cast %4 : vector<8xf32> to vector<8x1xf32>
    %cst_2 = arith.constant 3.125000e-02 : f32
    %6 = vector.broadcast %cst_2 : f32 to vector<8x1xf32>
    %7 = arith.mulf %2, %6 : vector<8x1xf32>
    %cst_3 = arith.constant 3.125000e-02 : f32
    %8 = vector.broadcast %cst_3 : f32 to vector<8x1xf32>
    %9 = arith.mulf %5, %8 : vector<8x1xf32>
    %10 = arith.mulf %7, %7 : vector<8x1xf32>
    %11 = arith.subf %9, %10 : vector<8x1xf32>
    %12 = vector.broadcast %7 : vector<8x1xf32> to vector<8x128xf32>
    %13 = arith.subf %0, %12 : vector<8x128xf32>
    %cst_4 = arith.constant 9.99999974E-6 : f32
    %14 = vector.broadcast %cst_4 : f32 to vector<8x1xf32>
    %15 = arith.addf %11, %14 : vector<8x1xf32>
    %16 = math.rsqrt %15 : vector<8x1xf32>
    %17 = vector.broadcast %16 : vector<8x1xf32> to vector<8x128xf32>
    %18 = arith.mulf %13, %17 : vector<8x128xf32>
    %c0_5 = arith.constant 0 : index
    %c0_6 = arith.constant 0 : index
    %19 = vector.load %arg2[%c0_5, %c0_6] : memref<1x128xf32, #tpu.memory_space<vmem>>, vector<1x128xf32>
    %20 = vector.broadcast %19 : vector<1x128xf32> to vector<8x128xf32>
    %21 = arith.mulf %18, %20 : vector<8x128xf32>
    %c0_7 = arith.constant 0 : index
    %c0_8 = arith.constant 0 : index
    %22 = vector.load %arg3[%c0_7, %c0_8] : memref<1x128xf32, #tpu.memory_space<vmem>>, vector<1x128xf32>
    %23 = vector.broadcast %22 : vector<1x128xf32> to vector<8x128xf32>
    %24 = arith.addf %21, %23 : vector<8x128xf32>
    %25 = arith.truncf %24 : vector<8x128xf32> to vector<8x128xbf16>
    %c0_9 = arith.constant 0 : index
    %c0_10 = arith.constant 0 : index
    %26 = vector.load %arg4[%c0_9, %c0_10] : memref<128x128xbf16, #tpu.memory_space<vmem>>, vector<128x128xbf16>
    %cst_11 = arith.constant dense<0.000000e+00> : vector<8x128xf32>
    %27 = tpu.matmul %25, %26, %cst_11 {dimension_numbers = #tpu.dot_dimension_numbers<[1], [0], [0], [1], [0, 0, 1, 1], [], []>} : vector<8x128xbf16>, vector<128x128xbf16>, vector<8x128xf32> -> vector<8x128xf32>
    %c0_12 = arith.constant 0 : index
    %c0_13 = arith.constant 0 : index
    %28 = vector.load %arg5[%c0_12, %c0_13] : memref<1x128xf32, #tpu.memory_space<vmem>>, vector<1x128xf32>
    %29 = vector.broadcast %28 : vector<1x128xf32> to vector<8x128xf32>
    %30 = arith.addf %27, %29 : vector<8x128xf32>
    %31 = arith.mulf %30, %30 : vector<8x128xf32>
    %32 = arith.mulf %30, %31 : vector<8x128xf32>
    %cst_14 = arith.constant 4.471500e-02 : f32
    %33 = vector.broadcast %cst_14 : f32 to vector<8x128xf32>
    %34 = arith.mulf %33, %32 : vector<8x128xf32>
    %35 = arith.addf %30, %34 : vector<8x128xf32>
    %cst_15 = arith.constant 0.797884583 : f32
    %36 = vector.broadcast %cst_15 : f32 to vector<8x128xf32>
    %37 = arith.mulf %36, %35 : vector<8x128xf32>
    %38 = math.tanh %37 : vector<8x128xf32>
    %cst_16 = arith.constant 1.000000e+00 : f32
    %39 = vector.broadcast %cst_16 : f32 to vector<8x128xf32>
    %40 = arith.addf %39, %38 : vector<8x128xf32>
    %cst_17 = arith.constant 5.000000e-01 : f32
    %41 = vector.broadcast %cst_17 : f32 to vector<8x128xf32>
    %42 = arith.mulf %41, %40 : vector<8x128xf32>
    %43 = arith.mulf %30, %42 : vector<8x128xf32>
    %44 = arith.truncf %43 : vector<8x128xf32> to vector<8x128xbf16>
    %c0_18 = arith.constant 0 : index
    %c0_19 = arith.constant 0 : index
    %45 = vector.load %arg6[%c0_18, %c0_19] : memref<128x128xbf16, #tpu.memory_space<vmem>>, vector<128x128xbf16>
    %cst_20 = arith.constant dense<0.000000e+00> : vector<8x128xf32>
    %46 = tpu.matmul %44, %45, %cst_20 {dimension_numbers = #tpu.dot_dimension_numbers<[1], [0], [0], [1], [0, 0, 1, 1], [], []>} : vector<8x128xbf16>, vector<128x128xbf16>, vector<8x128xf32> -> vector<8x128xf32>
    %c0_21 = arith.constant 0 : index
    %c0_22 = arith.constant 0 : index
    %47 = vector.load %arg7[%c0_21, %c0_22] : memref<1x128xf32, #tpu.memory_space<vmem>>, vector<1x128xf32>
    %48 = vector.broadcast %47 : vector<1x128xf32> to vector<8x128xf32>
    %49 = arith.addf %46, %48 : vector<8x128xf32>
    %c0_23 = arith.constant 0 : index
    %c0_24 = arith.constant 0 : index
    %50 = vector.load %arg8[%c0_23, %c0_24] : memref<8x128xf32, #tpu.memory_space<vmem>>, vector<8x128xf32>
    tpu.vector_store %arg8[%c0_23, %c0_24], %49 {strides = array<i32>} : memref<8x128xf32, #tpu.memory_space<vmem>>, vector<8x128xf32>,
    return
  }
  func.func @transform_0(%arg0: i32) -> (i32, i32) {
    %c0_i32 = arith.constant 0 : i32
    %c0_i32_0 = arith.constant 0 : i32
    return %arg0, %c0_i32 : i32, i32
  }
  func.func @transform_1(%arg0: i32) -> (i32, i32) {
    %c0_i32 = arith.constant 0 : i32
    %c0_i32_0 = arith.constant 0 : i32
    %c0_i32_1 = arith.constant 0 : i32
    return %c0_i32, %c0_i32_0 : i32, i32
  }
  func.func @transform_2(%arg0: i32) -> (i32, i32) {
    %c0_i32 = arith.constant 0 : i32
    %c0_i32_0 = arith.constant 0 : i32
    %c0_i32_1 = arith.constant 0 : i32
    return %c0_i32, %c0_i32_0 : i32, i32
  }
  func.func @transform_3(%arg0: i32) -> (i32, i32) {
    %c0_i32 = arith.constant 0 : i32
    %c0_i32_0 = arith.constant 0 : i32
    %c0_i32_1 = arith.constant 0 : i32
    return %c0_i32, %c0_i32_0 : i32, i32
  }
  func.func @transform_4(%arg0: i32) -> (i32, i32) {
    %c0_i32 = arith.constant 0 : i32
    %c0_i32_0 = arith.constant 0 : i32
    %c0_i32_1 = arith.constant 0 : i32
    return %c0_i32, %c0_i32_0 : i32, i32
  }
  func.func @transform_5(%arg0: i32) -> (i32, i32) {
    %c0_i32 = arith.constant 0 : i32
    %c0_i32_0 = arith.constant 0 : i32
    %c0_i32_1 = arith.constant 0 : i32
    return %c0_i32, %c0_i32_0 : i32, i32
  }
  func.func @transform_6(%arg0: i32) -> (i32, i32) {
    %c0_i32 = arith.constant 0 : i32
    %c0_i32_0 = arith.constant 0 : i32
    %c0_i32_1 = arith.constant 0 : i32
    return %c0_i32, %c0_i32_0 : i32, i32
  }
  func.func @transform_7(%arg0: i32) -> (i32, i32) {
    %c0_i32 = arith.constant 0 : i32
    %c0_i32_0 = arith.constant 0 : i32
    return %arg0, %c0_i32 : i32, i32
  }
}

module attributes {stable_mosaic.version = 11 : i64} {
  func.func @mlp_kernel(%arg0: i32, %arg1: memref<8x128xf32, #tpu.memory_space<vmem>>, %arg2: memref<1x128xf32, #tpu.memory_space<vmem>>, %arg3: memref<1x128xf32, #tpu.memory_space<vmem>>, %arg4: memref<128x128xbf16, #tpu.memory_space<vmem>>, %arg5: memref<1x128xf32, #tpu.memory_space<vmem>>, %arg6: memref<128x128xbf16, #tpu.memory_space<vmem>>, %arg7: memref<1x128xf32, #tpu.memory_space<vmem>>, %arg8: memref<8x128xf32, #tpu.memory_space<vmem>>) attributes {dimension_semantics = [#tpu.dimension_semantics<parallel>], iteration_bounds = array<i64: 2>, scalar_prefetch = 0 : i64, scratch_operands = 0 : i64, tpu.core_type = #tpu.core_type<tc>, window_params = [{transform_indices = @transform_0, window_bounds = array<i64: 8, 128>}, {pipeline_mode = #tpu.pipeline_mode<synchronous>, transform_indices = @transform_1, window_bounds = array<i64: 1, 128>}, {pipeline_mode = #tpu.pipeline_mode<synchronous>, transform_indices = @transform_2, window_bounds = array<i64: 1, 128>}, {pipeline_mode = #tpu.pipeline_mode<synchronous>, transform_indices = @transform_3, window_bounds = array<i64: 128, 128>}, {pipeline_mode = #tpu.pipeline_mode<synchronous>, transform_indices = @transform_4, window_bounds = array<i64: 1, 128>}, {pipeline_mode = #tpu.pipeline_mode<synchronous>, transform_indices = @transform_5, window_bounds = array<i64: 128, 128>}, {pipeline_mode = #tpu.pipeline_mode<synchronous>, transform_indices = @transform_6, window_bounds = array<i64: 1, 128>}, {transform_indices = @transform_7, window_bounds = array<i64: 8, 128>}]} {
    %c0 = arith.constant 0 : index
    %c0_0 = arith.constant 0 : index
    %0 = vector.load %arg1[%c0, %c0_0] : memref<8x128xf32, #tpu.memory_space<vmem>>, vector<8x128xf32>
    %cst = arith.constant dense<0.000000e+00> : vector<8xf32>
    %1 = vector.multi_reduction <add>, %0, %cst [1] : vector<8x128xf32> to vector<8xf32>
    %2 = vector.shape_cast %1 : vector<8xf32> to vector<8x1xf32>
    %3 = arith.mulf %0, %0 : vector<8x128xf32>
    %cst_1 = arith.constant dense<0.000000e+00> : vector<8xf32>
    %4 = vector.multi_reduction <add>, %3, %cst_1 [1] : vector<8x128xf32> to vector<8xf32>
    %5 = vector.shape_cast %4 : vector<8xf32> to vector<8x1xf32>
    %cst_2 = arith.constant 3.125000e-02 : f32
    %6 = vector.broadcast %cst_2 : f32 to vector<8x1xf32>
    %7 = arith.mulf %2, %6 : vector<8x1xf32>
    %cst_3 = arith.constant 3.125000e-02 : f32
    %8 = vector.broadcast %cst_3 : f32 to vector<8x1xf32>
    %9 = arith.mulf %5, %8 : vector<8x1xf32>
    %10 = arith.mulf %7, %7 : vector<8x1xf32>
    %11 = arith.subf %9, %10 : vector<8x1xf32>
    %12 = vector.broadcast %7 : vector<8x1xf32> to vector<8x128xf32>
    %13 = arith.subf %0, %12 : vector<8x128xf32>
    %cst_4 = arith.constant 9.99999974E-6 : f32
    %14 = vector.broadcast %cst_4 : f32 to vector<8x1xf32>
    %15 = arith.addf %11, %14 : vector<8x1xf32>
    %16 = math.rsqrt %15 : vector<8x1xf32>
    %17 = vector.broadcast %16 : vector<8x1xf32> to vector<8x128xf32>
    %18 = arith.mulf %13, %17 : vector<8x128xf32>
    %c0_5 = arith.constant 0 : index
    %c0_6 = arith.constant 0 : index
    %19 = vector.load %arg2[%c0_5, %c0_6] : memref<1x128xf32, #tpu.memory_space<vmem>>, vector<1x128xf32>
    %20 = vector.broadcast %19 : vector<1x128xf32> to vector<8x128xf32>
    %21 = arith.mulf %18, %20 : vector<8x128xf32>
    %c0_7 = arith.constant 0 : index
    %c0_8 = arith.constant 0 : index
    %22 = vector.load %arg3[%c0_7, %c0_8] : memref<1x128xf32, #tpu.memory_space<vmem>>, vector<1x128xf32>
    %23 = vector.broadcast %22 : vector<1x128xf32> to vector<8x128xf32>
    %24 = arith.addf %21, %23 : vector<8x128xf32>
    %25 = arith.truncf %24 : vector<8x128xf32> to vector<8x128xbf16>
    %c0_9 = arith.constant 0 : index
    %c0_10 = arith.constant 0 : index
    %26 = vector.load %arg4[%c0_9, %c0_10] : memref<128x128xbf16, #tpu.memory_space<vmem>>, vector<128x128xbf16>
    %cst_11 = arith.constant dense<0.000000e+00> : vector<8x128xf32>
    %27 = tpu.matmul %25, %26, %cst_11 {dimension_numbers = #tpu.dot_dimension_numbers<[1], [0], [0], [1], [0, 0, 1, 1], [], []>} : vector<8x128xbf16>, vector<128x128xbf16>, vector<8x128xf32> -> vector<8x128xf32>
    %c0_12 = arith.constant 0 : index
    %c0_13 = arith.constant 0 : index
    %28 = vector.load %arg5[%c0_12, %c0_13] : memref<1x128xf32, #tpu.memory_space<vmem>>, vector<1x128xf32>
    %29 = vector.broadcast %28 : vector<1x128xf32> to vector<8x128xf32>
    %30 = arith.addf %27, %29 : vector<8x128xf32>
    %31 = arith.mulf %30, %30 : vector<8x128xf32>
    %32 = arith.mulf %30, %31 : vector<8x128xf32>
    %cst_14 = arith.constant 4.471500e-02 : f32
    %33 = vector.broadcast %cst_14 : f32 to vector<8x128xf32>
    %34 = arith.mulf %33, %32 : vector<8x128xf32>
    %35 = arith.addf %30, %34 : vector<8x128xf32>
    %cst_15 = arith.constant 0.797884583 : f32
    %36 = vector.broadcast %cst_15 : f32 to vector<8x128xf32>
    %37 = arith.mulf %36, %35 : vector<8x128xf32>
    %38 = math.tanh %37 : vector<8x128xf32>
    %cst_16 = arith.constant 1.000000e+00 : f32
    %39 = vector.broadcast %cst_16 : f32 to vector<8x128xf32>
    %40 = arith.addf %39, %38 : vector<8x128xf32>
    %cst_17 = arith.constant 5.000000e-01 : f32
    %41 = vector.broadcast %cst_17 : f32 to vector<8x128xf32>
    %42 = arith.mulf %41, %40 : vector<8x128xf32>
    %43 = arith.mulf %30, %42 : vector<8x128xf32>
    %44 = arith.truncf %43 : vector<8x128xf32> to vector<8x128xbf16>
    %c0_18 = arith.constant 0 : index
    %c0_19 = arith.constant 0 : index
    %45 = vector.load %arg6[%c0_18, %c0_19] : memref<128x128xbf16, #tpu.memory_space<vmem>>, vector<128x128xbf16>
    %cst_20 = arith.constant dense<0.000000e+00> : vector<8x128xf32>
    %46 = tpu.matmul %44, %45, %cst_20 {dimension_numbers = #tpu.dot_dimension_numbers<[1], [0], [0], [1], [0, 0, 1, 1], [], []>} : vector<8x128xbf16>, vector<128x128xbf16>, vector<8x128xf32> -> vector<8x128xf32>
    %c0_21 = arith.constant 0 : index
    %c0_22 = arith.constant 0 : index
    %47 = vector.load %arg7[%c0_21, %c0_22] : memref<1x128xf32, #tpu.memory_space<vmem>>, vector<1x128xf32>
    %48 = vector.broadcast %47 : vector<1x128xf32> to vector<8x128xf32>
    %49 = arith.addf %46, %48 : vector<8x128xf32>
    %c0_23 = arith.constant 0 : index
    %c0_24 = arith.constant 0 : index
    %50 = vector.load %arg8[%c0_23, %c0_24] : memref<8x128xf32, #tpu.memory_space<vmem>>, vector<8x128xf32>
    tpu.vector_store %arg8[%c0_23, %c0_24], %49 {strides = array<i32>} : memref<8x128xf32, #tpu.memory_space<vmem>>, vector<8x128xf32>,
    return
  }
  func.func @transform_0(%arg0: i32) -> (i32, i32) {
    %c0_i32 = arith.constant 0 : i32
    %c0_i32_0 = arith.constant 0 : i32
    return %arg0, %c0_i32 : i32, i32
  }
  func.func @transform_1(%arg0: i32) -> (i32, i32) {
    %c0_i32 = arith.constant 0 : i32
    %c0_i32_0 = arith.constant 0 : i32
    %c0_i32_1 = arith.constant 0 : i32
    return %c0_i32, %c0_i32_0 : i32, i32
  }
  func.func @transform_2(%arg0: i32) -> (i32, i32) {
    %c0_i32 = arith.constant 0 : i32
    %c0_i32_0 = arith.constant 0 : i32
    %c0_i32_1 = arith.constant 0 : i32
    return %c0_i32, %c0_i32_0 : i32, i32
  }
  func.func @transform_3(%arg0: i32) -> (i32, i32) {
    %c0_i32 = arith.constant 0 : i32
    %c0_i32_0 = arith.constant 0 : i32
    %c0_i32_1 = arith.constant 0 : i32
    return %c0_i32, %c0_i32_0 : i32, i32
  }
  func.func @transform_4(%arg0: i32) -> (i32, i32) {
    %c0_i32 = arith.constant 0 : i32
    %c0_i32_0 = arith.constant 0 : i32
    %c0_i32_1 = arith.constant 0 : i32
    return %c0_i32, %c0_i32_0 : i32, i32
  }
  func.func @transform_5(%arg0: i32) -> (i32, i32) {
    %c0_i32 = arith.constant 0 : i32
    %c0_i32_0 = arith.constant 0 : i32
    %c0_i32_1 = arith.constant 0 : i32
    return %c0_i32, %c0_i32_0 : i32, i32
  }
  func.func @transform_6(%arg0: i32) -> (i32, i32) {
    %c0_i32 = arith.constant 0 : i32
    %c0_i32_0 = arith.constant 0 : i32
    %c0_i32_1 = arith.constant 0 : i32
    return %c0_i32, %c0_i32_0 : i32, i32
  }
  func.func @transform_7(%arg0: i32) -> (i32, i32) {
    %c0_i32 = arith.constant 0 : i32
    %c0_i32_0 = arith.constant 0 : i32
    return %arg0, %c0_i32 : i32, i32
  }
}

</mosaic_0001>

<bundles_post_ra>
// kernel: tpu_custom_call.1
= control target key start
LH: loop header
LB: loop body
LE: loop exit
PB: predicated region body
PF: predicated region fallthrough
CT: control target
= control target key end

     0   :  { %s1285_s0 = inlined_call_operand.hbm [shape: f32[16,128], index: 0, kind: input, shape index: {}]   ;;  %s1286_s1 = inlined_call_operand.vmem [shape: f32[1,128], index: 1, kind: input, shape index: {}]   ;;  %s1287_s2 = inlined_call_operand.vmem [shape: f32[1,128], index: 2, kind: input, shape index: {}]   ;;  %s1288_s3 = inlined_call_operand.hbm [shape: bf16[128,128], index: 3, kind: input, shape index: {}]   ;;  %s1289_s4 = inlined_call_operand.vmem [shape: f32[1,128], index: 4, kind: input, shape index: {}]   ;;  %s1290_s5 = inlined_call_operand.hbm [shape: bf16[128,128], index: 5, kind: input, shape index: {}]   ;;  %s1291_s6 = inlined_call_operand.vmem [shape: f32[1,128], index: 6, kind: input, shape index: {}]   ;;  %s1292_s7 = inlined_call_operand.hbm [shape: f32[16,128], index: 7, kind: output, shape index: {}]  }
   0x1   :  { %1297 = sst [smem:[#allocation12_spill]] %s1288_s3 }
   0x2   :  { %1298 = sst [smem:[#allocation13_spill]] %s1290_s5 }
   0x3   :  { %12 = vsyncpa [#allocation3], 0 }
   0x4   :  { %14 = vsyncpa [#allocation3 + $0x1], 0 }
   0x5   :  { %15 = vsyncpa [#allocation6], 0 }
   0x6   :  { %16 = vsyncpa [#allocation4], 0 }
   0x7   :  { %18 = vsyncpa [#allocation4 + $0x1], 0  ;;  %s1074_s24 = smov 0   ;;  %s1076_s25 = smov 0  }
   0x8   :  { %s1078_s26 = smov 0   ;;  %s1080_s27 = smov 0  }
   0x9 LB: > { %s1095_s28 = sadd.s32 4294967295, %s1024_s27   ;;  %s691_s29 = sadd.s32 4294967294, %s1024_s27   ;;  %s1024_s27 = sphi %s1080_s27, %s1318_s27   ;;  %s1020_s26 = sphi %s1078_s26, %s1317_s26   ;;  %s1016_s25 = sphi %s1076_s25, %s1316_s25   ;;  %s1012_s24 = sphi %s1074_s24, %s1315_s24  }
   0xa   : > { %p44_p0 = scmp.ne.s32.totalorder %s1016_s25, %s1012_s24  ;;  %p1293_p1 = scmp.eq.s32.totalorder %s1095_s28, 0 }
   0xb   : > { %p200_p3 = scmp.eq.s32.totalorder %s691_s29, 1  ;;  %p692_p5 = scmp.ge.s32.totalorder %s1024_s27, 1 }
   0xc   : > { %p1104_p4 = por %p1293_p1, %p44_p0  ;;  %p207_p7 = scmp.lt.s32.totalorder %s1024_s27, 3 }
   0xd   : > { %p1109_p6 = por %p200_p3, %p44_p0  ;;  %s1026_s10 = smov [#allocation5]  }
   0xe   : > { %s1299_s30 = scalar_select %p1104_p4, 1, 0 }
   0xf   : > { %s1300_s8 = scalar_select %p1109_p6, 1, 0 }
  0x10   : > { %p1114_p8 = pnand %p692_p5, %p207_p7  ;;  %s225_s11 = sshll.u32 %s1026_s10, 4  ;;  %s226_s11 = int_to_ptr.vmem [resolvable:$true] %s225_s11 }
  0x11   : > { %s1027_s13 = smov [#allocation7]   ;;  %s887_s15 = scalar_lea.vmem %s226_s11, 1024 }
  0x12   : > { %s1301_s9 = scalar_select %p1114_p8, 1, 0 }
  0x13   : > { %p797_p9 = pneg %p1114_p8  ;;  %s241_s14 = sshll.u32 %s1027_s13, 4  ;;  %s242_s14 = int_to_ptr.vmem [resolvable:$true] %s241_s14 }
  0x14   : > { %p888_p13 = scmp.ne.s32.totalorder %s226_s11, %s887_s15  ;;  %p895_p5 = scmp.lt.s32.totalorder %s226_s11, %s226_s11 }
  0x15   : > { %p1123_p11 = pnand %p797_p9, %p1293_p1  ;;  %p896_p7 = scmp.lt.s32.totalorder %s887_s15, %s887_s15 }
  0x17   : > { %p878_p12 = pneg %p1123_p11  ;;  %p897_p10 = por %p896_p7, %p895_p5 }
  0x19   : > { %p890_p0 = pnand %p888_p13, %p878_p12 }
  0x1b   : > { %p891_p3 = pneg %p890_p0 }
  0x1d   : > { %p898_p9 = pnand %p897_p10, %p891_p3 }
  0x1f   : > { %901 = shalt.err (!%p898_p9)
}
  0x20   : > { %s1028_s16 = smov 64   ;;  %s1029_s17 = smov 4  }
  0x21   : > { %s1303_s3 = sld [smem:[#allocation12_spill]]  ;;  %s913_s20 = scalar_lea.vmem %s242_s14, 1024 }
  0x22   : > { %p914_p1 = scmp.ne.s32.totalorder %s242_s14, %s913_s20  ;;  %p921_p2 = scmp.lt.s32.totalorder %s242_s14, %s242_s14 }
  0x23   : > { %p922_p6 = scmp.lt.s32.totalorder %s913_s20, %s913_s20 }
  0x24   : > { %p916_p13 = pnand %p914_p1, %p878_p12 }
  0x25   : > { %p923_p5 = por %p922_p6, %p921_p2 }
  0x26   : > { %p917_p0 = pneg %p916_p13 }
  0x27   : > { %800 = dma.hbm_to_vmem [thread:$0]  (!%p1123_p11), %s1303_s3, 1024, %s226_s11, [#allocation6], %s1028_s16, %s1028_s16, %s1029_s17  }
  0x28   : > { %p924_p10 = pnand %p923_p5, %p917_p0 }
  0x2a   : > { %927 = shalt.err (!%p924_p10)
}
  0x2b   : > { %s1304_s5 = sld [smem:[#allocation13_spill]]  ;;  %s1146_s23 = sadd.s32 1, %s1024_s27  }
  0x2c   : > { %s31_s29 = sadd.s32 1, %s1020_s26  ;;  %s28_s10 = ssub.s32 %s1024_s27, %s1146_s23 }
  0x2d   : > { %p38_p1 = scmp.ne.s32.totalorder %s1020_s26, %s1016_s25  ;;  %p29_p2 = scmp.eq.s32.totalorder %s28_s10, 0 }
  0x2e   : > { %p39_p6 = scmp.eq.s32.totalorder %s1024_s27, 0  ;;  %p1305_p12 = scmp.eq.s32.totalorder %s1095_s28, 1 }
  0x2f   : > { %p814_p7 = scmp.lt.s32.totalorder %s1024_s27, 2  ;;  %s258_s13 = sand.u32 1, %s1020_s26  }
  0x30   : > { %p1156_p3 = por %p1305_p12, %p38_p1  ;;  %p40_p9 = por %p39_p6, %p38_p1 }
  0x31   : > { %803 = dma.hbm_to_vmem [thread:$0]  (!%p1123_p11), %s1304_s5, 1024, %s242_s14, [#allocation6], %s1028_s16, %s1028_s16, %s1029_s17  }
  0x32   : > { %s1306_s11 = scalar_select %p1156_p3, 1, 0 }
  0x33   : > { %s1162_s12 = scalar_select %p29_p2, %s1020_s26, %s31_s29  }
  0x34   : > { %s696_s15 = sshll.u32 %s258_s13, 3  ;;  %s697_s14 = sshll.u32 %s1024_s27, 7 }
  0x35   : > { %s1169_s18 = scalar_lea.hbm %s1285_s0, %s697_s14  ;;  %s262_s19 = scalar_lea.vmem [#allocation2], %s696_s15 }
  0x36   : > { %s269_s20 = sshll.u32 %s262_s19, 4  ;;  %p1171_p11 = pnand %p814_p7, %p40_p9  ;;  %s270_s20 = int_to_ptr.vmem [resolvable:$true] %s269_s20 }
  0x37   : > { %s259_s22 = scalar_lea.sflag [#allocation3], %s258_s13  ;;  %s928_s29 = scalar_lea.hbm %s1169_s18, 128 }
  0x38   : > { %p929_p13 = scmp.ne.s32.totalorder %s1169_s18, %s928_s29  ;;  %p930_p0 = pneg %p1171_p11 }
  0x39   : > { %s933_s16 = scalar_lea.hbm %s1285_s0, 256  ;;  %p934_p1 = scmp.lt.s32.totalorder %s1169_s18, %s1285_s0 }
  0x3a   : > { %p931_p5 = pnand %p930_p0, %p929_p13  ;;  %p935_p2 = scmp.lt.s32.totalorder %s933_s16, %s928_s29 }
  0x3c   : > { %p932_p10 = pneg %p931_p5  ;;  %p936_p6 = por %p935_p2, %p934_p1 }
  0x3e   : > { %p937_p12 = pnand %p936_p6, %p932_p10 }
  0x40   : > { %940 = shalt.err (!%p937_p12)
}
  0x41   : > { %s941_s19 = scalar_lea.vmem %s270_s20, 128  ;;  %s1030_s13 = smov [#allocation2]  }
  0x42   : > { %p942_p7 = scmp.ne.s32.totalorder %s270_s20, %s941_s19  ;;  %s946_s3 = sshll.u32 %s1030_s13, 4  ;;  %s947_s3 = int_to_ptr.vmem [resolvable:$false] %s946_s3 }
  0x43   : > { %s948_s5 = scalar_lea.vmem %s947_s3, 256  ;;  %p949_p13 = scmp.lt.s32.totalorder %s270_s20, %s947_s3 }
  0x44   : > { %p944_p9 = pnand %p942_p7, %p930_p0  ;;  %p950_p5 = scmp.lt.s32.totalorder %s948_s5, %s941_s19 }
  0x46   : > { %p945_p3 = pneg %p944_p9  ;;  %p951_p4 = por %p950_p5, %p949_p13 }
  0x48   : > { %p952_p8 = pnand %p951_p4, %p945_p3 }
  0x4a   : > { %955 = shalt.err (!%p952_p8)
}
  0x4b   : > { %807 = dma.hbm_to_vmem [thread:$0]  (!%p1171_p11), %s1169_s18, 128, %s270_s20, %s259_s22  }
  0x4c   : > { %p1308_p10 = scmp.ne.s32.totalorder %s1301_s9, 0 }
  0x4d   : > { %s1192_s29 = sand.u32 (!%p1308_p10), 1, %s1016_s25   ;;  %p1309_p4 = scmp.ne.s32.totalorder (!%p1308_p10), %s1299_s30, 0 }
  0x4e   : > { %278 = sbr.rel (%p1308_p10) target bundleno = 694 (0x2b6), region = 48  ;;  %s699_s10 = sshll.u32 (!%p1308_p10), %s1192_s29, 3 }
  0x4f   : > { %s281_s3 = scalar_lea.sflag (!%p1308_p10), [#allocation3], %s1192_s29  ;;  %s284_s5 = scalar_lea.vmem (!%p1308_p10), [#allocation2], %s699_s10 }
  0x53   : > { %999 = dma.done.wait (%p1309_p4), %s281_s3, 128  }
  0x54   : > { %1001 = vsyncadd (%p1309_p4), %s281_s3, 4294967168  ;;  %p1310_p8 = scmp.eq.s32.totalorder %s1095_s28, 0 }
  0x56   : > { %1003 = dma.done.wait (%p1310_p8), [#allocation6], 2048   ;;  %p1311_p3 = pmov %p1310_p8 }
  0x57   : > { %v324_v0 = vld [vmem:[%s284_s5] sm:$0xff]  ;;  %v1031_v3 = vmov 0.0   ;;  %v858_v5 = vld [vmem:[#allocation5 + $0x28] sm:$0xff]   ;;  %v859_v6 = vld [vmem:[#allocation5 + $0x20] sm:$0xff]   ;;  %vm1032_vm0 = vmmov 0   ;;  %s724_s17 = sshll.u32 %s1095_s28, 7 }
  0x58   : > { %1005 = vsyncadd (%p1311_p3), [#allocation6], 4294965248  ;;  %325 = vadd.xlane.f32.xlu0 %v324_v0  ;;  %v327_v1 = vmul.f32 %v324_v0, %v324_v0  ;;  %v856_v2 = vld [vmem:[#allocation5 + $0x38] sm:$0xff]   ;;  %745 = vmatprep.subr.bf16.mxu0 %v1031_v3  ;;  %v857_v4 = vld [vmem:[#allocation5 + $0x30] sm:$0xff]   ;;  %s322_s15 = scalar_lea.vmem [#allocation8], %s699_s10  ;;  %s1242_s5 = scalar_lea.hbm %s1292_s7, %s724_s17 }
  0x59   : > { %765 = vmatprep.subr.bf16.mxu1 %v1031_v3  ;;  %746 = vmatpush3.bf16.msra.mxu0 %v856_v2  ;;  %v860_v7 = vld [vmem:[#allocation5 + $0x18] sm:$0xff]   ;;  %v861_v8 = vld [vmem:[#allocation5 + $0x10] sm:$0xff]   ;;  %v862_v9 = vld [vmem:[#allocation5 + $0x8] sm:$0xff]   ;;  %s602_s19 = sshll.u32 %s322_s15, 4  ;;  %s589_s30 = scalar_lea.sflag [#allocation4], %s1192_s29  ;;  %s1244_s19 = int_to_ptr.vmem [resolvable:$true] %s602_s19 }
  0x5a   : > { %747 = vmatprep.subr.bf16.mxu0 %v1031_v3  ;;  %761 = vmatprep.mubr.msk.bf16.mxu0 %vm1032_vm0, %v1031_v3  ;;  %v863_v10 = vld [vmem:[#allocation5] sm:$0xff]   ;;  %v703_v20 = vld [vmem:[%s1286_s1] ss:$0 sm:$0xff]  ;;  %v864_v26 = vld [vmem:[#allocation7 + $0x38] sm:$0xff]   ;;  %s956_s28 = scalar_lea.vmem %s1244_s19, 128  ;;  %p1312_p0 = scmp.ne.s32.totalorder %s1306_s11, 0 }
  0x5b   : > { %781 = vmatprep.mubr.msk.bf16.mxu1 %vm1032_vm0, %v1031_v3  ;;  %v704_v22 = vld [vmem:[%s1287_s2] ss:$0 sm:$0xff]  ;;  %766 = vmatpush3.bf16.msra.mxu1 %v864_v26  ;;  %v866_v28 = vld [vmem:[#allocation7 + $0x28] sm:$0xff]   ;;  %v867_v29 = vld [vmem:[#allocation7 + $0x20] sm:$0xff]   ;;  %p957_p11 = scmp.ne.s32.totalorder %s1244_s19, %s956_s28  ;;  %s1033_s10 = smov [#allocation8]  }
  0x5c   : > { %328 = vadd.xlane.f32.xlu0 %v327_v1  ;;  %767 = vmatprep.subr.bf16.mxu1 %v1031_v3  ;;  %v865_v27 = vld [vmem:[#allocation7 + $0x30] sm:$0xff]   ;;  %v868_v30 = vld [vmem:[#allocation7 + $0x18] sm:$0xff]   ;;  %v870_v32 = vld [vmem:[#allocation7 + $0x8] sm:$0xff]   ;;  %s960_s9 = sshll.u32 %s1033_s10, 4  ;;  %s961_s9 = int_to_ptr.vmem [resolvable:$false] %s960_s9 }
  0x5d   : > { %748 = vmatpush3.bf16.msra.mxu0 %v857_v4  ;;  %v869_v31 = vld [vmem:[#allocation7 + $0x10] sm:$0xff]   ;;  %v871_v33 = vld [vmem:[#allocation7] sm:$0xff]   ;;  %p958_p1 = pnand %p957_p11, %p1312_p0  ;;  %s962_s18 = scalar_lea.vmem %s961_s9, 256 }
  0x5e   : > { %749 = vmatprep.subr.bf16.mxu0 %v1031_v3  ;;  %v705_v34 = vld [vmem:[%s1289_s4] ss:$0 sm:$0xff]  ;;  %p963_p6 = scmp.lt.s32.totalorder %s1244_s19, %s961_s9  ;;  %p964_p12 = scmp.lt.s32.totalorder %s962_s18, %s956_s28 }
  0x5f   : > { %768 = vmatpush3.bf16.msra.mxu1 %v865_v27  ;;  %v714_v50 = vld [vmem:[%s1291_s6] ss:$0 sm:$0xff]  ;;  %p959_p2 = pneg %p958_p1 }
  0x60   : > { %769 = vmatprep.subr.bf16.mxu1 %v1031_v3  ;;  %p965_p7 = por %p964_p12, %p963_p6 }
  0x61   : > { %750 = vmatpush3.bf16.msra.mxu0 %v858_v5 }
  0x62   : > { %751 = vmatprep.subr.bf16.mxu0 %v1031_v3  ;;  %p966_p9 = pnand %p965_p7, %p959_p2 }
  0x63   : > { %770 = vmatpush3.bf16.msra.mxu1 %v866_v28 }
  0x64   : > { %771 = vmatprep.subr.bf16.mxu1 %v1031_v3 }
  0x65   : > { %752 = vmatpush3.bf16.msra.mxu0 %v859_v6 }
  0x66   : > { %753 = vmatprep.subr.bf16.mxu0 %v1031_v3 }
  0x67   : > { %772 = vmatpush3.bf16.msra.mxu1 %v867_v29 }
  0x68   : > { %773 = vmatprep.subr.bf16.mxu1 %v1031_v3 }
  0x69   : > { %754 = vmatpush3.bf16.msra.mxu0 %v860_v7 }
  0x6a   : > { %755 = vmatprep.subr.bf16.mxu0 %v1031_v3 }
  0x6b   : > { %774 = vmatpush3.bf16.msra.mxu1 %v868_v30 }
  0x6c   : > { %775 = vmatprep.subr.bf16.mxu1 %v1031_v3 }
  0x6d   : > { %756 = vmatpush3.bf16.msra.mxu0 %v861_v8 }
  0x6e   : > { %757 = vmatprep.subr.bf16.mxu0 %v1031_v3 }
  0x6f   : > { %776 = vmatpush3.bf16.msra.mxu1 %v869_v31 }
  0x70   : > { %777 = vmatprep.subr.bf16.mxu1 %v1031_v3 }
  0x71   : > { %758 = vmatpush3.bf16.msra.mxu0 %v862_v9 }
  0x72   : > { %759 = vmatprep.subr.bf16.mxu0 %v1031_v3 }
  0x73   : > { %778 = vmatpush3.bf16.msra.mxu1 %v870_v32 }
  0x74   : > { %779 = vmatprep.subr.bf16.mxu1 %v1031_v3 }
  0x75   : > { %760 = vmatpush3.bf16.msra.mxu0 %v863_v10 }
  0x77   : > { %780 = vmatpush3.bf16.msra.mxu1 %v871_v33 }
  0xe1   : > { %v326_v11 = vpop.xlane.xlu0 %325 }
  0xe2   : > { %v330_v12 = vmul.f32 0.03125, %v326_v11 }
  0xe4   : > { %v332_v14 = vmul.f32 %v330_v12, %v330_v12  ;;  %v334_v18 = vsub.f32 %v324_v0, %v330_v12 }
  0xe5   : > { %v329_v13 = vpop.xlane.xlu0 %328 }
  0xe6   : > { %v331_v15 = vmul.f32 0.03125, %v329_v13 }
  0xe8   : > { %v333_v16 = vsub.f32 %v331_v15, %v332_v14 }
  0xea   : > { %v335_v17 = vadd.f32 1e-05, %v333_v16 }
  0xec   : > { %872 = vrsqrt.f32 %v335_v17 }
  0xf9   : > { %v873_v19 = vpop.eup %872 }
  0xfa   : > { %v337_v21 = vmul.f32 %v873_v19, %v334_v18 }
  0xfc   : > { %v345_v23 = vmul.f32 %v703_v20, %v337_v21 }
  0xfe   : > { %v353_v24 = vadd.f32 %v704_v22, %v345_v23 }
 0x100   : > { %v354_v25 = vpack.c.bf16 %v353_v24, %v353_v24 }
 0x102   : > { %762 = vmatmul.mubr.bf16.vlgmr.msra.gmra.mxu0 %v354_v25 }
 0x1c2   : > { %v460_v35 = vpop.f32.mrf.mxu0 }
 0x1c3   : > { %v461_v36 = vadd.f32 %v705_v34, %v460_v35 }
 0x1c4   : > { %v763_v37 = vpop.f32.mrf.mxu0 }
 0x1c5   : > { %v466_v38 = vmul.f32 %v461_v36, %v461_v36 }
 0x1c6   : > { %v463_v39 = vpop.f32.mrf.mxu0 }
 0x1c7   : > { %v467_v40 = vmul.f32 %v466_v38, %v461_v36 }
 0x1c8   : > { %v764_v41 = vpop.f32.mrf.mxu0 }
 0x1c9   : > { %v468_v42 = vmul.f32 0.044715, %v467_v40 }
 0x1cb   : > { %v469_v43 = vadd.f32 %v468_v42, %v461_v36 }
 0x1cd   : > { %v470_v44 = vmul.f32 0.7978846, %v469_v43 }
 0x1cf   : > { %874 = vtanh.f32 %v470_v44 }
 0x1dc   : > { %v875_v45 = vpop.eup %874 }
 0x1dd   : > { %v472_v46 = vadd.f32 1.0, %v875_v45 }
 0x1df   : > { %v473_v47 = vmul.f32 0.5, %v472_v46 }
 0x1e1   : > { %v474_v48 = vmul.f32 %v473_v47, %v461_v36 }
 0x1e3   : > { %v475_v49 = vpack.c.bf16 %v474_v48, %v474_v48 }
 0x1e5   : > { %782 = vmatmul.mubr.bf16.vlgmr.msra.gmra.mxu1 %v475_v49 }
 0x2a5   : > { %v581_v51 = vpop.f32.mrf.mxu1 }
 0x2a6   : > { %v582_v52 = vadd.f32 %v714_v50, %v581_v51 }
 0x2a7   : > { %v783_v53 = vpop.f32.mrf.mxu1 }
 0x2a8   : > { %587 = vst [vmem:[%s322_s15] sm:$0xff] %v582_v52 }
 0x2a9   : > { %v584_v54 = vpop.f32.mrf.mxu1 }
 0x2aa   : > { %969 = shalt.err (!%p966_p9)
}
 0x2ab   : > { %s970_s20 = scalar_lea.hbm %s1242_s5, 128  ;;  %s974_s22 = scalar_lea.hbm %s1292_s7, 256 }
 0x2ac   : > { %p971_p13 = scmp.ne.s32.totalorder %s1242_s5, %s970_s20  ;;  %p975_p4 = scmp.lt.s32.totalorder %s1242_s5, %s1292_s7 }
 0x2ad   : > { %p976_p8 = scmp.lt.s32.totalorder %s974_s22, %s970_s20 }
 0x2ae   : > { %p972_p5 = pnand %p971_p13, %p1312_p0 }
 0x2af   : > { %p977_p3 = por %p976_p8, %p975_p4 }
 0x2b0   : > { %p973_p10 = pneg %p972_p5 }
 0x2b2   : > { %p978_p11 = pnand %p977_p3, %p973_p10 }
 0x2b4   : > { %981 = shalt.err (!%p978_p11)
}
 0x2b5   : > { %795 = dma.vmem_to_hbm [thread:$0]  (%p1312_p0), %s1244_s19, 128, %s1242_s5, %s589_s30   ;;  %v784_v55 = vpop.f32.mrf.mxu1 }
 0x2b6 PF: > { %s614_s17 = sand.u32 1, %s1012_s24   ;;  %p1313_p1 = scmp.ne.s32.totalorder %s1300_s8, 0 }
 0x2b7   : > { %p1314_p2 = scmp.ge.s32.totalorder %s1024_s27, 2  ;;  %s615_s15 = scalar_lea.sflag [#allocation4], %s614_s17 }
 0x2b9   : > { %p809_p6 = pnand %p1314_p2, %p1313_p1 }
 0x2bb   : > { %p810_p12 = pneg %p809_p6 }
 0x2bd   : > { %1007 = dma.done.wait (%p810_p12), %s615_s15, 128  }
 0x2be   : > { %1009 = vsyncadd (%p810_p12), %s615_s15, 4294967168  ;;  %p21_p7 = scmp.ge.s32.totalorder %s1146_s23, 4   ;;  %s1315_s24 = smov %s1016_s25 }
 0x2bf   : > { %s1316_s25 = smov %s1020_s26  ;;  %s1317_s26 = smov %s1162_s12 }
 0x2c0   : > { %s1318_s27 = smov %s1146_s23  ;;  %23 = sbr.rel (!%p21_p7) target bundleno = 9 (0x9), region = 101 }
 0x2c5   :  { %620 = vsyncpa [#allocation3], 1 }
 0x2c6   :  { %622 = vsyncpa [#allocation3 + $0x1], 1 }
 0x2c7   :  { %623 = vsyncpa [#allocation6], 1 }
 0x2c8   :  { %624 = vsyncpa [#allocation4], 1 }
 0x2c9   :  { %626 = vsyncpa [#allocation4 + $0x1], 1 }

// kernel: tpu_custom_call.1
= control target key start
LH: loop header
LB: loop body
LE: loop exit
PB: predicated region body
PF: predicated region fallthrough
CT: control target
= control target key end

     0   :  { %s1285_s0 = inlined_call_operand.hbm [shape: f32[16,128], index: 0, kind: input, shape index: {}]   ;;  %s1286_s1 = inlined_call_operand.vmem [shape: f32[1,128], index: 1, kind: input, shape index: {}]   ;;  %s1287_s2 = inlined_call_operand.vmem [shape: f32[1,128], index: 2, kind: input, shape index: {}]   ;;  %s1288_s3 = inlined_call_operand.hbm [shape: bf16[128,128], index: 3, kind: input, shape index: {}]   ;;  %s1289_s4 = inlined_call_operand.vmem [shape: f32[1,128], index: 4, kind: input, shape index: {}]   ;;  %s1290_s5 = inlined_call_operand.hbm [shape: bf16[128,128], index: 5, kind: input, shape index: {}]   ;;  %s1291_s6 = inlined_call_operand.vmem [shape: f32[1,128], index: 6, kind: input, shape index: {}]   ;;  %s1292_s7 = inlined_call_operand.hbm [shape: f32[16,128], index: 7, kind: output, shape index: {}]  }
   0x1   :  { %1297 = sst [smem:[#allocation12_spill]] %s1288_s3 }
   0x2   :  { %1298 = sst [smem:[#allocation13_spill]] %s1290_s5 }
   0x3   :  { %12 = vsyncpa [#allocation3], 0 }
   0x4   :  { %14 = vsyncpa [#allocation3 + $0x1], 0 }
   0x5   :  { %15 = vsyncpa [#allocation6], 0 }
   0x6   :  { %16 = vsyncpa [#allocation4], 0 }
   0x7   :  { %18 = vsyncpa [#allocation4 + $0x1], 0  ;;  %s1074_s24 = smov 0   ;;  %s1076_s25 = smov 0  }
   0x8   :  { %s1078_s26 = smov 0   ;;  %s1080_s27 = smov 0  }
   0x9 LB: > { %s1095_s28 = sadd.s32 4294967295, %s1024_s27   ;;  %s691_s29 = sadd.s32 4294967294, %s1024_s27   ;;  %s1024_s27 = sphi %s1080_s27, %s1318_s27   ;;  %s1020_s26 = sphi %s1078_s26, %s1317_s26   ;;  %s1016_s25 = sphi %s1076_s25, %s1316_s25   ;;  %s1012_s24 = sphi %s1074_s24, %s1315_s24  }
   0xa   : > { %p44_p0 = scmp.ne.s32.totalorder %s1016_s25, %s1012_s24  ;;  %p1293_p1 = scmp.eq.s32.totalorder %s1095_s28, 0 }
   0xb   : > { %p200_p3 = scmp.eq.s32.totalorder %s691_s29, 1  ;;  %p692_p5 = scmp.ge.s32.totalorder %s1024_s27, 1 }
   0xc   : > { %p1104_p4 = por %p1293_p1, %p44_p0  ;;  %p207_p7 = scmp.lt.s32.totalorder %s1024_s27, 3 }
   0xd   : > { %p1109_p6 = por %p200_p3, %p44_p0  ;;  %s1026_s10 = smov [#allocation5]  }
   0xe   : > { %s1299_s30 = scalar_select %p1104_p4, 1, 0 }
   0xf   : > { %s1300_s8 = scalar_select %p1109_p6, 1, 0 }
  0x10   : > { %p1114_p8 = pnand %p692_p5, %p207_p7  ;;  %s225_s11 = sshll.u32 %s1026_s10, 4  ;;  %s226_s11 = int_to_ptr.vmem [resolvable:$true] %s225_s11 }
  0x11   : > { %s1027_s13 = smov [#allocation7]   ;;  %s887_s15 = scalar_lea.vmem %s226_s11, 1024 }
  0x12   : > { %s1301_s9 = scalar_select %p1114_p8, 1, 0 }
  0x13   : > { %p797_p9 = pneg %p1114_p8  ;;  %s241_s14 = sshll.u32 %s1027_s13, 4  ;;  %s242_s14 = int_to_ptr.vmem [resolvable:$true] %s241_s14 }
  0x14   : > { %p888_p13 = scmp.ne.s32.totalorder %s226_s11, %s887_s15  ;;  %p895_p5 = scmp.lt.s32.totalorder %s226_s11, %s226_s11 }
  0x15   : > { %p1123_p11 = pnand %p797_p9, %p1293_p1  ;;  %p896_p7 = scmp.lt.s32.totalorder %s887_s15, %s887_s15 }
  0x17   : > { %p878_p12 = pneg %p1123_p11  ;;  %p897_p10 = por %p896_p7, %p895_p5 }
  0x19   : > { %p890_p0 = pnand %p888_p13, %p878_p12 }
  0x1b   : > { %p891_p3 = pneg %p890_p0 }
  0x1d   : > { %p898_p9 = pnand %p897_p10, %p891_p3 }
  0x1f   : > { %901 = shalt.err (!%p898_p9)
}
  0x20   : > { %s1028_s16 = smov 64   ;;  %s1029_s17 = smov 4  }
  0x21   : > { %s1303_s3 = sld [smem:[#allocation12_spill]]  ;;  %s913_s20 = scalar_lea.vmem %s242_s14, 1024 }
  0x22   : > { %p914_p1 = scmp.ne.s32.totalorder %s242_s14, %s913_s20  ;;  %p921_p2 = scmp.lt.s32.totalorder %s242_s14, %s242_s14 }
  0x23   : > { %p922_p6 = scmp.lt.s32.totalorder %s913_s20, %s913_s20 }
  0x24   : > { %p916_p13 = pnand %p914_p1, %p878_p12 }
  0x25   : > { %p923_p5 = por %p922_p6, %p921_p2 }
  0x26   : > { %p917_p0 = pneg %p916_p13 }
  0x27   : > { %800 = dma.hbm_to_vmem [thread:$0]  (!%p1123_p11), %s1303_s3, 1024, %s226_s11, [#allocation6], %s1028_s16, %s1028_s16, %s1029_s17  }
  0x28   : > { %p924_p10 = pnand %p923_p5, %p917_p0 }
  0x2a   : > { %927 = shalt.err (!%p924_p10)
}
  0x2b   : > { %s1304_s5 = sld [smem:[#allocation13_spill]]  ;;  %s1146_s23 = sadd.s32 1, %s1024_s27  }
  0x2c   : > { %s31_s29 = sadd.s32 1, %s1020_s26  ;;  %s28_s10 = ssub.s32 %s1024_s27, %s1146_s23 }
  0x2d   : > { %p38_p1 = scmp.ne.s32.totalorder %s1020_s26, %s1016_s25  ;;  %p29_p2 = scmp.eq.s32.totalorder %s28_s10, 0 }
  0x2e   : > { %p39_p6 = scmp.eq.s32.totalorder %s1024_s27, 0  ;;  %p1305_p12 = scmp.eq.s32.totalorder %s1095_s28, 1 }
  0x2f   : > { %p814_p7 = scmp.lt.s32.totalorder %s1024_s27, 2  ;;  %s258_s13 = sand.u32 1, %s1020_s26  }
  0x30   : > { %p1156_p3 = por %p1305_p12, %p38_p1  ;;  %p40_p9 = por %p39_p6, %p38_p1 }
  0x31   : > { %803 = dma.hbm_to_vmem [thread:$0]  (!%p1123_p11), %s1304_s5, 1024, %s242_s14, [#allocation6], %s1028_s16, %s1028_s16, %s1029_s17  }
  0x32   : > { %s1306_s11 = scalar_select %p1156_p3, 1, 0 }
  0x33   : > { %s1162_s12 = scalar_select %p29_p2, %s1020_s26, %s31_s29  }
  0x34   : > { %s696_s15 = sshll.u32 %s258_s13, 3  ;;  %s697_s14 = sshll.u32 %s1024_s27, 7 }
  0x35   : > { %s1169_s18 = scalar_lea.hbm %s1285_s0, %s697_s14  ;;  %s262_s19 = scalar_lea.vmem [#allocation2], %s696_s15 }
  0x36   : > { %s269_s20 = sshll.u32 %s262_s19, 4  ;;  %p1171_p11 = pnand %p814_p7, %p40_p9  ;;  %s270_s20 = int_to_ptr.vmem [resolvable:$true] %s269_s20 }
  0x37   : > { %s259_s22 = scalar_lea.sflag [#allocation3], %s258_s13  ;;  %s928_s29 = scalar_lea.hbm %s1169_s18, 128 }
  0x38   : > { %p929_p13 = scmp.ne.s32.totalorder %s1169_s18, %s928_s29  ;;  %p930_p0 = pneg %p1171_p11 }
  0x39   : > { %s933_s16 = scalar_lea.hbm %s1285_s0, 256  ;;  %p934_p1 = scmp.lt.s32.totalorder %s1169_s18, %s1285_s0 }
  0x3a   : > { %p931_p5 = pnand %p930_p0, %p929_p13  ;;  %p935_p2 = scmp.lt.s32.totalorder %s933_s16, %s928_s29 }
  0x3c   : > { %p932_p10 = pneg %p931_p5  ;;  %p936_p6 = por %p935_p2, %p934_p1 }
  0x3e   : > { %p937_p12 = pnand %p936_p6, %p932_p10 }
  0x40   : > { %940 = shalt.err (!%p937_p12)
}
  0x41   : > { %s941_s19 = scalar_lea.vmem %s270_s20, 128  ;;  %s1030_s13 = smov [#allocation2]  }
  0x42   : > { %p942_p7 = scmp.ne.s32.totalorder %s270_s20, %s941_s19  ;;  %s946_s3 = sshll.u32 %s1030_s13, 4  ;;  %s947_s3 = int_to_ptr.vmem [resolvable:$false] %s946_s3 }
  0x43   : > { %s948_s5 = scalar_lea.vmem %s947_s3, 256  ;;  %p949_p13 = scmp.lt.s32.totalorder %s270_s20, %s947_s3 }
  0x44   : > { %p944_p9 = pnand %p942_p7, %p930_p0  ;;  %p950_p5 = scmp.lt.s32.totalorder %s948_s5, %s941_s19 }
  0x46   : > { %p945_p3 = pneg %p944_p9  ;;  %p951_p4 = por %p950_p5, %p949_p13 }
  0x48   : > { %p952_p8 = pnand %p951_p4, %p945_p3 }
  0x4a   : > { %955 = shalt.err (!%p952_p8)
}
  0x4b   : > { %807 = dma.hbm_to_vmem [thread:$0]  (!%p1171_p11), %s1169_s18, 128, %s270_s20, %s259_s22  }
  0x4c   : > { %p1308_p10 = scmp.ne.s32.totalorder %s1301_s9, 0 }
  0x4d   : > { %s1192_s29 = sand.u32 (!%p1308_p10), 1, %s1016_s25   ;;  %p1309_p4 = scmp.ne.s32.totalorder (!%p1308_p10), %s1299_s30, 0 }
  0x4e   : > { %278 = sbr.rel (%p1308_p10) target bundleno = 694 (0x2b6), region = 48  ;;  %s699_s10 = sshll.u32 (!%p1308_p10), %s1192_s29, 3 }
  0x4f   : > { %s281_s3 = scalar_lea.sflag (!%p1308_p10), [#allocation3], %s1192_s29  ;;  %s284_s5 = scalar_lea.vmem (!%p1308_p10), [#allocation2], %s699_s10 }
  0x53   : > { %999 = dma.done.wait (%p1309_p4), %s281_s3, 128  }
  0x54   : > { %1001 = vsyncadd (%p1309_p4), %s281_s3, 4294967168  ;;  %p1310_p8 = scmp.eq.s32.totalorder %s1095_s28, 0 }
  0x56   : > { %1003 = dma.done.wait (%p1310_p8), [#allocation6], 2048   ;;  %p1311_p3 = pmov %p1310_p8 }
  0x57   : > { %v324_v0 = vld [vmem:[%s284_s5] sm:$0xff]  ;;  %v1031_v3 = vmov 0.0   ;;  %v858_v5 = vld [vmem:[#allocation5 + $0x28] sm:$0xff]   ;;  %v859_v6 = vld [vmem:[#allocation5 + $0x20] sm:$0xff]   ;;  %vm1032_vm0 = vmmov 0   ;;  %s724_s17 = sshll.u32 %s1095_s28, 7 }
  0x58   : > { %1005 = vsyncadd (%p1311_p3), [#allocation6], 4294965248  ;;  %325 = vadd.xlane.f32.xlu0 %v324_v0  ;;  %v327_v1 = vmul.f32 %v324_v0, %v324_v0  ;;  %v856_v2 = vld [vmem:[#allocation5 + $0x38] sm:$0xff]   ;;  %745 = vmatprep.subr.bf16.mxu0 %v1031_v3  ;;  %v857_v4 = vld [vmem:[#allocation5 + $0x30] sm:$0xff]   ;;  %s322_s15 = scalar_lea.vmem [#allocation8], %s699_s10  ;;  %s1242_s5 = scalar_lea.hbm %s1292_s7, %s724_s17 }
  0x59   : > { %765 = vmatprep.subr.bf16.mxu1 %v1031_v3  ;;  %746 = vmatpush3.bf16.msra.mxu0 %v856_v2  ;;  %v860_v7 = vld [vmem:[#allocation5 + $0x18] sm:$0xff]   ;;  %v861_v8 = vld [vmem:[#allocation5 + $0x10] sm:$0xff]   ;;  %v862_v9 = vld [vmem:[#allocation5 + $0x8] sm:$0xff]   ;;  %s602_s19 = sshll.u32 %s322_s15, 4  ;;  %s589_s30 = scalar_lea.sflag [#allocation4], %s1192_s29  ;;  %s1244_s19 = int_to_ptr.vmem [resolvable:$true] %s602_s19 }
  0x5a   : > { %747 = vmatprep.subr.bf16.mxu0 %v1031_v3  ;;  %761 = vmatprep.mubr.msk.bf16.mxu0 %vm1032_vm0, %v1031_v3  ;;  %v863_v10 = vld [vmem:[#allocation5] sm:$0xff]   ;;  %v703_v20 = vld [vmem:[%s1286_s1] ss:$0 sm:$0xff]  ;;  %v864_v26 = vld [vmem:[#allocation7 + $0x38] sm:$0xff]   ;;  %s956_s28 = scalar_lea.vmem %s1244_s19, 128  ;;  %p1312_p0 = scmp.ne.s32.totalorder %s1306_s11, 0 }
  0x5b   : > { %781 = vmatprep.mubr.msk.bf16.mxu1 %vm1032_vm0, %v1031_v3  ;;  %v704_v22 = vld [vmem:[%s1287_s2] ss:$0 sm:$0xff]  ;;  %766 = vmatpush3.bf16.msra.mxu1 %v864_v26  ;;  %v866_v28 = vld [vmem:[#allocation7 + $0x28] sm:$0xff]   ;;  %v867_v29 = vld [vmem:[#allocation7 + $0x20] sm:$0xff]   ;;  %p957_p11 = scmp.ne.s32.totalorder %s1244_s19, %s956_s28  ;;  %s1033_s10 = smov [#allocation8]  }
  0x5c   : > { %328 = vadd.xlane.f32.xlu0 %v327_v1  ;;  %767 = vmatprep.subr.bf16.mxu1 %v1031_v3  ;;  %v865_v27 = vld [vmem:[#allocation7 + $0x30] sm:$0xff]   ;;  %v868_v30 = vld [vmem:[#allocation7 + $0x18] sm:$0xff]   ;;  %v870_v32 = vld [vmem:[#allocation7 + $0x8] sm:$0xff]   ;;  %s960_s9 = sshll.u32 %s1033_s10, 4  ;;  %s961_s9 = int_to_ptr.vmem [resolvable:$false] %s960_s9 }
  0x5d   : > { %748 = vmatpush3.bf16.msra.mxu0 %v857_v4  ;;  %v869_v31 = vld [vmem:[#allocation7 + $0x10] sm:$0xff]   ;;  %v871_v33 = vld [vmem:[#allocation7] sm:$0xff]   ;;  %p958_p1 = pnand %p957_p11, %p1312_p0  ;;  %s962_s18 = scalar_lea.vmem %s961_s9, 256 }
  0x5e   : > { %749 = vmatprep.subr.bf16.mxu0 %v1031_v3  ;;  %v705_v34 = vld [vmem:[%s1289_s4] ss:$0 sm:$0xff]  ;;  %p963_p6 = scmp.lt.s32.totalorder %s1244_s19, %s961_s9  ;;  %p964_p12 = scmp.lt.s32.totalorder %s962_s18, %s956_s28 }
  0x5f   : > { %768 = vmatpush3.bf16.msra.mxu1 %v865_v27  ;;  %v714_v50 = vld [vmem:[%s1291_s6] ss:$0 sm:$0xff]  ;;  %p959_p2 = pneg %p958_p1 }
  0x60   : > { %769 = vmatprep.subr.bf16.mxu1 %v1031_v3  ;;  %p965_p7 = por %p964_p12, %p963_p6 }
  0x61   : > { %750 = vmatpush3.bf16.msra.mxu0 %v858_v5 }
  0x62   : > { %751 = vmatprep.subr.bf16.mxu0 %v1031_v3  ;;  %p966_p9 = pnand %p965_p7, %p959_p2 }
  0x63   : > { %770 = vmatpush3.bf16.msra.mxu1 %v866_v28 }
  0x64   : > { %771 = vmatprep.subr.bf16.mxu1 %v1031_v3 }
  0x65   : > { %752 = vmatpush3.bf16.msra.mxu0 %v859_v6 }
  0x66   : > { %753 = vmatprep.subr.bf16.mxu0 %v1031_v3 }
  0x67   : > { %772 = vmatpush3.bf16.msra.mxu1 %v867_v29 }
  0x68   : > { %773 = vmatprep.subr.bf16.mxu1 %v1031_v3 }
  0x69   : > { %754 = vmatpush3.bf16.msra.mxu0 %v860_v7 }
  0x6a   : > { %755 = vmatprep.subr.bf16.mxu0 %v1031_v3 }
  0x6b   : > { %774 = vmatpush3.bf16.msra.mxu1 %v868_v30 }
  0x6c   : > { %775 = vmatprep.subr.bf16.mxu1 %v1031_v3 }
  0x6d   : > { %756 = vmatpush3.bf16.msra.mxu0 %v861_v8 }
  0x6e   : > { %757 = vmatprep.subr.bf16.mxu0 %v1031_v3 }
  0x6f   : > { %776 = vmatpush3.bf16.msra.mxu1 %v869_v31 }
  0x70   : > { %777 = vmatprep.subr.bf16.mxu1 %v1031_v3 }
  0x71   : > { %758 = vmatpush3.bf16.msra.mxu0 %v862_v9 }
  0x72   : > { %759 = vmatprep.subr.bf16.mxu0 %v1031_v3 }
  0x73   : > { %778 = vmatpush3.bf16.msra.mxu1 %v870_v32 }
  0x74   : > { %779 = vmatprep.subr.bf16.mxu1 %v1031_v3 }
  0x75   : > { %760 = vmatpush3.bf16.msra.mxu0 %v863_v10 }
  0x77   : > { %780 = vmatpush3.bf16.msra.mxu1 %v871_v33 }
  0xe1   : > { %v326_v11 = vpop.xlane.xlu0 %325 }
  0xe2   : > { %v330_v12 = vmul.f32 0.03125, %v326_v11 }
  0xe4   : > { %v332_v14 = vmul.f32 %v330_v12, %v330_v12  ;;  %v334_v18 = vsub.f32 %v324_v0, %v330_v12 }
  0xe5   : > { %v329_v13 = vpop.xlane.xlu0 %328 }
  0xe6   : > { %v331_v15 = vmul.f32 0.03125, %v329_v13 }
  0xe8   : > { %v333_v16 = vsub.f32 %v331_v15, %v332_v14 }
  0xea   : > { %v335_v17 = vadd.f32 1e-05, %v333_v16 }
  0xec   : > { %872 = vrsqrt.f32 %v335_v17 }
  0xf9   : > { %v873_v19 = vpop.eup %872 }
  0xfa   : > { %v337_v21 = vmul.f32 %v873_v19, %v334_v18 }
  0xfc   : > { %v345_v23 = vmul.f32 %v703_v20, %v337_v21 }
  0xfe   : > { %v353_v24 = vadd.f32 %v704_v22, %v345_v23 }
 0x100   : > { %v354_v25 = vpack.c.bf16 %v353_v24, %v353_v24 }
 0x102   : > { %762 = vmatmul.mubr.bf16.vlgmr.msra.gmra.mxu0 %v354_v25 }
 0x1c2   : > { %v460_v35 = vpop.f32.mrf.mxu0 }
 0x1c3   : > { %v461_v36 = vadd.f32 %v705_v34, %v460_v35 }
 0x1c4   : > { %v763_v37 = vpop.f32.mrf.mxu0 }
 0x1c5   : > { %v466_v38 = vmul.f32 %v461_v36, %v461_v36 }
 0x1c6   : > { %v463_v39 = vpop.f32.mrf.mxu0 }
 0x1c7   : > { %v467_v40 = vmul.f32 %v466_v38, %v461_v36 }
 0x1c8   : > { %v764_v41 = vpop.f32.mrf.mxu0 }
 0x1c9   : > { %v468_v42 = vmul.f32 0.044715, %v467_v40 }
 0x1cb   : > { %v469_v43 = vadd.f32 %v468_v42, %v461_v36 }
 0x1cd   : > { %v470_v44 = vmul.f32 0.7978846, %v469_v43 }
 0x1cf   : > { %874 = vtanh.f32 %v470_v44 }
 0x1dc   : > { %v875_v45 = vpop.eup %874 }
 0x1dd   : > { %v472_v46 = vadd.f32 1.0, %v875_v45 }
 0x1df   : > { %v473_v47 = vmul.f32 0.5, %v472_v46 }
 0x1e1   : > { %v474_v48 = vmul.f32 %v473_v47, %v461_v36 }
 0x1e3   : > { %v475_v49 = vpack.c.bf16 %v474_v48, %v474_v48 }
 0x1e5   : > { %782 = vmatmul.mubr.bf16.vlgmr.msra.gmra.mxu1 %v475_v49 }
 0x2a5   : > { %v581_v51 = vpop.f32.mrf.mxu1 }
 0x2a6   : > { %v582_v52 = vadd.f32 %v714_v50, %v581_v51 }
 0x2a7   : > { %v783_v53 = vpop.f32.mrf.mxu1 }
 0x2a8   : > { %587 = vst [vmem:[%s322_s15] sm:$0xff] %v582_v52 }
 0x2a9   : > { %v584_v54 = vpop.f32.mrf.mxu1 }
 0x2aa   : > { %969 = shalt.err (!%p966_p9)
}
 0x2ab   : > { %s970_s20 = scalar_lea.hbm %s1242_s5, 128  ;;  %s974_s22 = scalar_lea.hbm %s1292_s7, 256 }
 0x2ac   : > { %p971_p13 = scmp.ne.s32.totalorder %s1242_s5, %s970_s20  ;;  %p975_p4 = scmp.lt.s32.totalorder %s1242_s5, %s1292_s7 }
 0x2ad   : > { %p976_p8 = scmp.lt.s32.totalorder %s974_s22, %s970_s20 }
 0x2ae   : > { %p972_p5 = pnand %p971_p13, %p1312_p0 }
 0x2af   : > { %p977_p3 = por %p976_p8, %p975_p4 }
 0x2b0   : > { %p973_p10 = pneg %p972_p5 }
 0x2b2   : > { %p978_p11 = pnand %p977_p3, %p973_p10 }
 0x2b4   : > { %981 = shalt.err (!%p978_p11)
}
 0x2b5   : > { %795 = dma.vmem_to_hbm [thread:$0]  (%p1312_p0), %s1244_s19, 128, %s1242_s5, %s589_s30   ;;  %v784_v55 = vpop.f32.mrf.mxu1 }
 0x2b6 PF: > { %s614_s17 = sand.u32 1, %s1012_s24   ;;  %p1313_p1 = scmp.ne.s32.totalorder %s1300_s8, 0 }
 0x2b7   : > { %p1314_p2 = scmp.ge.s32.totalorder %s1024_s27, 2  ;;  %s615_s15 = scalar_lea.sflag [#allocation4], %s614_s17 }
 0x2b9   : > { %p809_p6 = pnand %p1314_p2, %p1313_p1 }
 0x2bb   : > { %p810_p12 = pneg %p809_p6 }
 0x2bd   : > { %1007 = dma.done.wait (%p810_p12), %s615_s15, 128  }
 0x2be   : > { %1009 = vsyncadd (%p810_p12), %s615_s15, 4294967168  ;;  %p21_p7 = scmp.ge.s32.totalorder %s1146_s23, 4   ;;  %s1315_s24 = smov %s1016_s25 }
 0x2bf   : > { %s1316_s25 = smov %s1020_s26  ;;  %s1317_s26 = smov %s1162_s12 }
 0x2c0   : > { %s1318_s27 = smov %s1146_s23  ;;  %23 = sbr.rel (!%p21_p7) target bundleno = 9 (0x9), region = 101 }
 0x2c5   :  { %620 = vsyncpa [#allocation3], 1 }
 0x2c6   :  { %622 = vsyncpa [#allocation3 + $0x1], 1 }
 0x2c7   :  { %623 = vsyncpa [#allocation6], 1 }
 0x2c8   :  { %624 = vsyncpa [#allocation4], 1 }
 0x2c9   :  { %626 = vsyncpa [#allocation4 + $0x1], 1 }

</bundles_post_ra>
